<compile_context>
chip_gen: v7x
topology: tpu7x:2x2x1
jax: 0.10.0
libtpu: 0.0.40
codegen_flags: <defaults>
</compile_context>

<pallas_src>
import jax
import jax.numpy as jnp
from jax.experimental import pallas as pl
from jax.experimental.pallas import tpu as pltpu


def _agloss_kernel(age_logits_ref, age_tgt_ref, gpred_ref, gtgt_ref, out_ref):
    # ---- age branch -------------------------------------------------------
    logits = age_logits_ref[...].astype(jnp.float32)          # (B, A)
    B, A = logits.shape

    # argmax over dim=1 on the raw logits (first occurrence of the max), +1.
    # Softmax is monotonic, so skipping it gives a bit-identical argmax.
    row_max = jnp.max(logits, axis=-1, keepdims=True)                 # (B, 1)
    lane_idx = jax.lax.broadcasted_iota(jnp.int32, logits.shape, 1)   # (B, A)
    arg = jnp.min(jnp.where(logits >= row_max, lane_idx, A),
                  axis=-1, keepdims=True)                             # (B, 1)
    age_expect = (arg + 1).astype(jnp.float32)                        # (B, 1)

    # age_targets.int(): truncation toward zero, then compared as numbers.
    tgt = age_tgt_ref[...].astype(jnp.int32).astype(jnp.float32)      # (B, 1)

    # smooth_l1_loss, beta = 1.0 (mean reduction applied at the end)
    diff = age_expect - tgt
    ad = jnp.abs(diff)
    sl1 = jnp.where(ad < 1.0, 0.5 * diff * diff, ad - 0.5)            # (B, 1)

    # ---- gender branch (lane-dense: one vreg, one EUP pass) ---------------
    x = gpred_ref[...].astype(jnp.float32)                            # (1, B)
    z = gtgt_ref[...].astype(jnp.float32)                             # (1, B)
    # numerically-stable BCE with logits: max(x,0) - x*z + log(1 + exp(-|x|))
    bce = jnp.maximum(x, 0.0) - x * z + jnp.log1p(jnp.exp(-jnp.abs(x)))

    # ---- total: single shared 1/B scale, scalar out through SMEM ----------
    out_ref[0, 0] = (jnp.sum(sl1) + jnp.sum(bce)) * jnp.float32(1.0 / B)


def agloss(age_preds, age_targets, gender_preds, gender_targets):
    """age_preds: (128, A) float/bf16; age_targets / gender_*: (128,)."""
    B, A = age_preds.shape
    assert B == 128, "module hard-codes batch of 128"

    # Zero-copy (metadata-only) reshapes; no concat/relayout op on the host.
    age_tgt = jnp.reshape(age_targets.astype(jnp.float32), (B, 1))
    gpred = jnp.reshape(gender_preds.astype(jnp.float32), (1, B))
    gtgt = jnp.reshape(gender_targets.astype(jnp.float32), (1, B))

    out = pl.pallas_call(
        _agloss_kernel,
        out_shape=jax.ShapeDtypeStruct((1, 1), jnp.float32),
        in_specs=[
            pl.BlockSpec(memory_space=pltpu.MemorySpace.VMEM),  # age logits
            pl.BlockSpec(memory_space=pltpu.MemorySpace.VMEM),  # age targets (B,1)
            pl.BlockSpec(memory_space=pltpu.MemorySpace.VMEM),  # gender preds (1,B)
            pl.BlockSpec(memory_space=pltpu.MemorySpace.VMEM),  # gender targets (1,B)
        ],
        out_specs=pl.BlockSpec(memory_space=pltpu.MemorySpace.SMEM),
        cost_estimate=pl.CostEstimate(
            flops=5 * B * A,
            transcendentals=2 * B,
            bytes_accessed=B * A * age_preds.dtype.itemsize + 3 * B * 4 + 4,
        ),
    )(age_preds, age_tgt, gpred, gtgt)
    return out[0, 0]


def _reference(age_preds, age_targets, gender_preds, gender_targets):
    # pure-JAX reference of the same math (for a quick sanity check)
    prob = jax.nn.softmax(age_preds.astype(jnp.float32), axis=1)
    age_expect = (jnp.argmax(prob, axis=1) + 1).astype(jnp.float32)
    tgt = age_targets.astype(jnp.int32).astype(jnp.float32)
    d = age_expect - tgt
    sl1 = jnp.where(jnp.abs(d) < 1.0, 0.5 * d * d, jnp.abs(d) - 0.5)
    age_loss = jnp.mean(sl1)
    x = gender_preds.astype(jnp.float32)
    z = gender_targets.astype(jnp.float32)
    bce = jnp.maximum(x, 0.0) - x * z + jnp.log1p(jnp.exp(-jnp.abs(x)))
    return age_loss + jnp.mean(bce)


if __name__ == "__main__":
    key = jax.random.PRNGKey(0)
    k1, k2, k3, k4 = jax.random.split(key, 4)

    B, A = 128, 100  # batch fixed at 128 by the module; 100 age classes
    age_preds = jax.random.normal(k1, (B, A), dtype=jnp.float32)
    age_targets = jax.random.randint(k2, (B,), 1, A + 1).astype(jnp.float32)
    gender_preds = jax.random.normal(k3, (B,), dtype=jnp.float32)
    gender_targets = jax.random.bernoulli(k4, 0.5, (B,)).astype(jnp.float32)

    out = agloss(age_preds, age_targets, gender_preds, gender_targets)
    jax.block_until_ready(out)

    ref = _reference(age_preds, age_targets, gender_preds, gender_targets)
    assert jnp.allclose(out, ref, rtol=1e-5, atol=1e-5), (out, ref)

    print("KERNEL_OK")
</pallas_src>

<mosaic_0001>
module attributes {stable_mosaic.version = 11 : i64} {
  func.func @_agloss_kernel(%arg0: memref<128x100xf32, #tpu.memory_space<vmem>>, %arg1: memref<128x1xf32, #tpu.memory_space<vmem>>, %arg2: memref<1x128xf32, #tpu.memory_space<vmem>>, %arg3: memref<1x128xf32, #tpu.memory_space<vmem>>, %arg4: memref<1x1xf32, #tpu.memory_space<smem>>) attributes {dimension_semantics = [], scalar_prefetch = 0 : i64, scratch_operands = 0 : i64, tpu.core_type = #tpu.core_type<tc>} {
    %c0 = arith.constant 0 : index
    %c0_0 = arith.constant 0 : index
    %0 = vector.load %arg0[%c0, %c0_0] : memref<128x100xf32, #tpu.memory_space<vmem>>, vector<128x100xf32>
    %cst = arith.constant dense<0xFF800000> : vector<128xf32>
    %1 = vector.multi_reduction <maximumf>, %0, %cst [1] : vector<128x100xf32> to vector<128xf32>
    %2 = vector.shape_cast %1 : vector<128xf32> to vector<128x1xf32>
    %3 = tpu.iota {dimensions = array<i32: 1>} : vector<128x100xi32>
    %4 = vector.broadcast %2 : vector<128x1xf32> to vector<128x100xf32>
    %5 = arith.cmpf oge, %0, %4 : vector<128x100xf32>
    %c100_i32 = arith.constant 100 : i32
    %6 = vector.broadcast %c100_i32 : i32 to vector<128x100xi32>
    %7 = arith.select %5, %3, %6 : vector<128x100xi1>, vector<128x100xi32>
    %cst_1 = arith.constant dense<2147483647> : vector<128xi32>
    %8 = vector.multi_reduction <minsi>, %7, %cst_1 [1] : vector<128x100xi32> to vector<128xi32>
    %9 = vector.shape_cast %8 : vector<128xi32> to vector<128x1xi32>
    %c1_i32 = arith.constant 1 : i32
    %10 = vector.broadcast %c1_i32 : i32 to vector<128x1xi32>
    %11 = arith.addi %9, %10 : vector<128x1xi32>
    %12 = arith.sitofp %11 : vector<128x1xi32> to vector<128x1xf32>
    %c0_2 = arith.constant 0 : index
    %c0_3 = arith.constant 0 : index
    %13 = vector.load %arg1[%c0_2, %c0_3] : memref<128x1xf32, #tpu.memory_space<vmem>>, vector<128x1xf32>
    %14 = arith.fptosi %13 : vector<128x1xf32> to vector<128x1xi32>
    %15 = arith.sitofp %14 : vector<128x1xi32> to vector<128x1xf32>
    %16 = arith.subf %12, %15 : vector<128x1xf32>
    %17 = math.absf %16 : vector<128x1xf32>
    %cst_4 = arith.constant 1.000000e+00 : f32
    %18 = vector.broadcast %cst_4 : f32 to vector<128x1xf32>
    %19 = arith.cmpf olt, %17, %18 : vector<128x1xf32>
    %cst_5 = arith.constant 5.000000e-01 : f32
    %20 = vector.broadcast %cst_5 : f32 to vector<128x1xf32>
    %21 = arith.mulf %20, %16 : vector<128x1xf32>
    %22 = arith.mulf %21, %16 : vector<128x1xf32>
    %cst_6 = arith.constant 5.000000e-01 : f32
    %23 = vector.broadcast %cst_6 : f32 to vector<128x1xf32>
    %24 = arith.subf %17, %23 : vector<128x1xf32>
    %25 = arith.select %19, %22, %24 : vector<128x1xi1>, vector<128x1xf32>
    %c0_7 = arith.constant 0 : index
    %c0_8 = arith.constant 0 : index
    %26 = vector.load %arg2[%c0_7, %c0_8] : memref<1x128xf32, #tpu.memory_space<vmem>>, vector<1x128xf32>
    %c0_9 = arith.constant 0 : index
    %c0_10 = arith.constant 0 : index
    %27 = vector.load %arg3[%c0_9, %c0_10] : memref<1x128xf32, #tpu.memory_space<vmem>>, vector<1x128xf32>
    %cst_11 = arith.constant 0.000000e+00 : f32
    %28 = vector.broadcast %cst_11 : f32 to vector<1x128xf32>
    %29 = arith.maximumf %26, %28 : vector<1x128xf32>
    %30 = arith.mulf %26, %27 : vector<1x128xf32>
    %31 = arith.subf %29, %30 : vector<1x128xf32>
    %32 = math.absf %26 : vector<1x128xf32>
    %cst_12 = arith.constant 0.000000e+00 : f32
    %33 = vector.broadcast %cst_12 : f32 to vector<1x128xf32>
    %34 = arith.subf %33, %32 : vector<1x128xf32>
    %35 = math.exp %34 : vector<1x128xf32>
    %36 = math.log1p %35 : vector<1x128xf32>
    %37 = arith.addf %31, %36 : vector<1x128xf32>
    %38 = vector.shape_cast %25 : vector<128x1xf32> to vector<1x128x1xf32>
    %cst_13 = arith.constant dense<0.000000e+00> : vector<1xf32>
    %39 = vector.multi_reduction <add>, %38, %cst_13 [1, 2] : vector<1x128x1xf32> to vector<1xf32>
    %40 = vector.shape_cast %39 : vector<1xf32> to vector<1x1x1xf32>
    %41 = vector.extract %40[0, 0, 0] : f32 from vector<1x1x1xf32>
    %42 = vector.shape_cast %37 : vector<1x128xf32> to vector<1x1x128xf32>
    %cst_14 = arith.constant dense<0.000000e+00> : vector<1xf32>
    %43 = vector.multi_reduction <add>, %42, %cst_14 [1, 2] : vector<1x1x128xf32> to vector<1xf32>
    %44 = vector.shape_cast %43 : vector<1xf32> to vector<1x1x1xf32>
    %45 = vector.extract %44[0, 0, 0] : f32 from vector<1x1x1xf32>
    %46 = arith.addf %41, %45 : f32
    %cst_15 = arith.constant 7.812500e-03 : f32
    %47 = arith.mulf %46, %cst_15 : f32
    %c0_16 = arith.constant 0 : index
    %c0_17 = arith.constant 0 : index
    %48 = memref.load %arg4[%c0_16, %c0_17] : memref<1x1xf32, #tpu.memory_space<smem>>
    memref.store %47, %arg4[%c0_16, %c0_17] : memref<1x1xf32, #tpu.memory_space<smem>>
    return
  }
}

</mosaic_0001>

<bundles_post_ra>
// kernel: tpu_custom_call.1
= control target key start
LH: loop header
LB: loop body
LE: loop exit
PB: predicated region body
PF: predicated region fallthrough
CT: control target
= control target key end

     0   :  { %vm34_vm0 = vcmask 818176   ;;  %s1320_s0 = inlined_call_operand.vmem [shape: f32[128,100], index: 0, kind: input, shape index: {}]   ;;  %s1321_s1 = inlined_call_operand.vmem [shape: f32[128,1], index: 1, kind: input, shape index: {}]   ;;  %s1322_s2 = inlined_call_operand.vmem [shape: f32[1,128], index: 2, kind: input, shape index: {}]   ;;  %s1323_s3 = inlined_call_operand.vmem [shape: f32[1,128], index: 3, kind: input, shape index: {}]   ;;  %s1324_s4 = inlined_call_operand.hbm [shape: f32[1,1], index: 4, kind: output, shape index: {}]  }
   0x1   :  { %v18_v0 = vld [vmem:[%s1320_s0] sm:$0xff]  ;;  %v20_v1 = vld [vmem:[%s1320_s0 + $0x10] sm:$0xff]  ;;  %v741_v2 = vld [vmem:[%s1320_s0 + $0x8] sm:$0xff] }
   0x2   :  { %v35_v3 = vsel %vm34_vm0, %v18_v0, -inf  ;;  %v41_v4 = vsel %vm34_vm0, %v20_v1, -inf  ;;  %v21_v5 = vld [vmem:[%s1320_s0 + $0x18] sm:$0xff]  ;;  %v38_v6 = vsel %vm34_vm0, %v741_v2, -inf  ;;  %v754_v8 = vld [vmem:[%s1320_s0 + $0x20] sm:$0xff]  ;;  %v759_v9 = vld [vmem:[%s1320_s0 + $0x28] sm:$0xff] }
   0x3   :  { %36 = vmax.xlane.f32.xlu0 %v35_v3  ;;  %42 = vmax.xlane.f32.xlu1 %v41_v4  ;;  %v44_v7 = vsel %vm34_vm0, %v21_v5, -inf }
   0x7   :  { %39 = vmax.xlane.f32.xlu0 %v38_v6  ;;  %45 = vmax.xlane.f32.xlu1 %v44_v7 }
   0x8   :  { %9 = vsyncpa [#allocation3], 0  ;;  %v47_v10 = vsel %vm34_vm0, %v754_v8, -inf  ;;  %v50_v11 = vsel %vm34_vm0, %v759_v9, -inf  ;;  %v768_v12 = vld [vmem:[%s1320_s0 + $0x30] sm:$0xff]  ;;  %v773_v13 = vld [vmem:[%s1320_s0 + $0x38] sm:$0xff]  ;;  %v83_v32 = vlaneseq }
   0x9   :  { %v53_v14 = vsel %vm34_vm0, %v768_v12, -inf  ;;  %v56_v15 = vsel %vm34_vm0, %v773_v13, -inf  ;;  %v782_v16 = vld [vmem:[%s1320_s0 + $0x40] sm:$0xff]  ;;  %v787_v17 = vld [vmem:[%s1320_s0 + $0x48] sm:$0xff]  ;;  %v796_v20 = vld [vmem:[%s1320_s0 + $0x50] sm:$0xff]  ;;  %s694_s30 = scalar_lea.hbm %s1324_s4, 16 }
   0xa   :  { %v59_v18 = vsel %vm34_vm0, %v782_v16, -inf  ;;  %v62_v19 = vsel %vm34_vm0, %v787_v17, -inf  ;;  %v801_v21 = vld [vmem:[%s1320_s0 + $0x58] sm:$0xff]  ;;  %v65_v22 = vsel %vm34_vm0, %v796_v20, -inf  ;;  %v810_v24 = vld [vmem:[%s1320_s0 + $0x60] sm:$0xff]  ;;  %v815_v25 = vld [vmem:[%s1320_s0 + $0x68] sm:$0xff]  ;;  %p695_p0 = scmp.ne.s32.totalorder %s1324_s4, %s694_s30  ;;  %p698_p1 = scmp.lt.u32.totalorder %s694_s30, %s1324_s4 }
   0xb   :  { %48 = vmax.xlane.f32.xlu0 %v47_v10  ;;  %51 = vmax.xlane.f32.xlu1 %v50_v11  ;;  %v68_v23 = vsel %vm34_vm0, %v801_v21, -inf  ;;  %v71_v26 = vsel %vm34_vm0, %v810_v24, -inf  ;;  %v74_v27 = vsel %vm34_vm0, %v815_v25, -inf  ;;  %v824_v28 = vld [vmem:[%s1320_s0 + $0x70] sm:$0xff]  ;;  %v829_v29 = vld [vmem:[%s1320_s0 + $0x78] sm:$0xff]  ;;  %v835_v33 = vand.u32 127, %v83_v32 }
   0xc   :  { %v77_v30 = vsel %vm34_vm0, %v824_v28, -inf  ;;  %v80_v31 = vsel %vm34_vm0, %v829_v29, -inf  ;;  %p700_p2 = pnand %p698_p1, %p695_p0 }
   0xf   :  { %54 = vmax.xlane.f32.xlu0 %v53_v14  ;;  %57 = vmax.xlane.f32.xlu1 %v56_v15 }
  0x13   :  { %60 = vmax.xlane.f32.xlu0 %v59_v18  ;;  %63 = vmax.xlane.f32.xlu1 %v62_v19 }
  0x17   :  { %66 = vmax.xlane.f32.xlu0 %v65_v22  ;;  %69 = vmax.xlane.f32.xlu1 %v68_v23 }
  0x1b   :  { %72 = vmax.xlane.f32.xlu0 %v71_v26  ;;  %75 = vmax.xlane.f32.xlu1 %v74_v27 }
  0x1f   :  { %78 = vmax.xlane.f32.xlu0 %v77_v30  ;;  %81 = vmax.xlane.f32.xlu1 %v80_v31 }
  0x90   :  { %v37_v34 = vpop.xlane.xlu0 %36  ;;  %v43_v35 = vpop.xlane.xlu1 %42 }
  0x91   :  { %vm85_vm1 = vcmp.ge.f32.partialorder %v18_v0, %v37_v34  ;;  %vm87_vm2 = vcmp.ge.f32.partialorder %v20_v1, %v43_v35 }
  0x92   :  { %v101_v36 = vsel %vm85_vm1, %v835_v33, 100  ;;  %v103_v37 = vsel %vm87_vm2, %v835_v33, 100 }
  0x93   :  { %v840_v38 = vsel %vm34_vm0, %v101_v36, 2147483647  ;;  %v843_v39 = vsel %vm34_vm0, %v103_v37, 2147483647 }
  0x94   :  { %v40_v40 = vpop.xlane.xlu0 %39  ;;  %v46_v41 = vpop.xlane.xlu1 %45  ;;  %v119_v42 = vshra.s32 %v840_v38, 16  ;;  %v149_v43 = vshra.s32 %v843_v39, 16 }
  0x95   :  { %vm86_vm3 = vcmp.ge.f32.partialorder %v741_v2, %v40_v40  ;;  %vm88_vm4 = vcmp.ge.f32.partialorder %v21_v5, %v46_v41 }
  0x96   :  { %v102_v44 = vsel %vm86_vm3, %v835_v33, 100  ;;  %v104_v45 = vsel %vm88_vm4, %v835_v33, 100  ;;  %v850_v46 = vcvt.s32.f32 %v119_v42  ;;  %v859_v51 = vcvt.s32.f32 %v149_v43 }
  0x97   :  { %v853_v47 = vsel %vm34_vm0, %v102_v44, 2147483647  ;;  %v856_v48 = vsel %vm34_vm0, %v104_v45, 2147483647 }
  0x98   :  { %122 = vmin.xlane.f32.xlu0 %v850_v46  ;;  %v49_v49 = vpop.xlane.xlu0 %48  ;;  %v52_v50 = vpop.xlane.xlu1 %51  ;;  %v134_v52 = vshra.s32 %v853_v47, 16  ;;  %v164_v53 = vshra.s32 %v856_v48, 16 }
  0x99   :  { %vm89_vm5 = vcmp.ge.f32.partialorder %v754_v8, %v49_v49  ;;  %vm90_vm6 = vcmp.ge.f32.partialorder %v759_v9, %v52_v50 }
  0x9a   :  { %v105_v54 = vsel %vm89_vm5, %v835_v33, 100  ;;  %v106_v55 = vsel %vm90_vm6, %v835_v33, 100  ;;  %v867_v56 = vcvt.s32.f32 %v134_v52  ;;  %v877_v61 = vcvt.s32.f32 %v164_v53 }
  0x9b   :  { %v870_v57 = vsel %vm34_vm0, %v105_v54, 2147483647  ;;  %v873_v58 = vsel %vm34_vm0, %v106_v55, 2147483647 }
  0x9c   :  { %152 = vmin.xlane.f32.xlu0 %v859_v51  ;;  %137 = vmin.xlane.f32.xlu1 %v867_v56  ;;  %v55_v59 = vpop.xlane.xlu0 %54  ;;  %v58_v60 = vpop.xlane.xlu1 %57  ;;  %v179_v62 = vshra.s32 %v870_v57, 16  ;;  %v194_v63 = vshra.s32 %v873_v58, 16 }
  0x9d   :  { %vm91_vm7 = vcmp.ge.f32.partialorder %v768_v12, %v55_v59  ;;  %vm92_vm8 = vcmp.ge.f32.partialorder %v773_v13, %v58_v60  ;;  %v118_v59 = vand.u32 65535, %v840_v38  ;;  %v163_v38 = vand.u32 65535, %v856_v48 }
  0x9e   :  { %v107_v0 = vsel %vm91_vm7, %v835_v33, 100  ;;  %v108_v1 = vsel %vm92_vm8, %v835_v33, 100  ;;  %v885_v2 = vcvt.s32.f32 %v179_v62  ;;  %v895_v7 = vcvt.s32.f32 %v194_v63 }
  0x9f   :  { %v888_v3 = vsel %vm34_vm0, %v107_v0, 2147483647  ;;  %v891_v4 = vsel %vm34_vm0, %v108_v1, 2147483647  ;;  %v120_v62 = vcvt.s32.f32 %v118_v59  ;;  %v133_v63 = vand.u32 65535, %v853_v47 }
  0xa0   :  { %167 = vmin.xlane.f32.xlu1 %v877_v61  ;;  %182 = vmin.xlane.f32.xlu0 %v885_v2  ;;  %v61_v5 = vpop.xlane.xlu0 %60  ;;  %v64_v6 = vpop.xlane.xlu1 %63  ;;  %v209_v8 = vshra.s32 %v888_v3, 16  ;;  %v224_v9 = vshra.s32 %v891_v4, 16  ;;  %v148_v0 = vand.u32 65535, %v843_v39  ;;  %v193_v48 = vand.u32 65535, %v873_v58 }
  0xa1   :  { %vm93_vm9 = vcmp.ge.f32.partialorder %v782_v16, %v61_v5  ;;  %vm94_vm10 = vcmp.ge.f32.partialorder %v787_v17, %v64_v6  ;;  %v223_v58 = vand.u32 65535, %v891_v4 }
  0xa2   :  { %v109_v10 = vsel %vm93_vm9, %v835_v33, 100  ;;  %v110_v11 = vsel %vm94_vm10, %v835_v33, 100  ;;  %v903_v12 = vcvt.s32.f32 %v209_v8  ;;  %v913_v18 = vcvt.s32.f32 %v224_v9 }
  0xa3   :  { %v906_v13 = vsel %vm34_vm0, %v109_v10, 2147483647  ;;  %v909_v14 = vsel %vm34_vm0, %v110_v11, 2147483647  ;;  %v135_v8 = vcvt.s32.f32 %v133_v63  ;;  %v150_v9 = vcvt.s32.f32 %v148_v0 }
  0xa4   :  { %197 = vmin.xlane.f32.xlu1 %v895_v7  ;;  %212 = vmin.xlane.f32.xlu0 %v903_v12  ;;  %v67_v15 = vpop.xlane.xlu0 %66  ;;  %v70_v16 = vpop.xlane.xlu1 %69  ;;  %v239_v17 = vshra.s32 %v906_v13, 16  ;;  %v254_v19 = vshra.s32 %v909_v14, 16  ;;  %v178_v10 = vand.u32 65535, %v870_v57  ;;  %v208_v57 = vand.u32 65535, %v888_v3 }
  0xa5   :  { %vm95_vm11 = vcmp.ge.f32.partialorder %v796_v20, %v67_v15  ;;  %vm96_vm12 = vcmp.ge.f32.partialorder %v801_v21, %v70_v16  ;;  %v165_v15 = vcvt.s32.f32 %v163_v38  ;;  %v238_v3 = vand.u32 65535, %v906_v13 }
  0xa6   :  { %v111_v22 = vsel %vm95_vm11, %v835_v33, 100  ;;  %v112_v23 = vsel %vm96_vm12, %v835_v33, 100  ;;  %v921_v26 = vcvt.s32.f32 %v239_v17  ;;  %v931_v32 = vcvt.s32.f32 %v254_v19 }
  0xa7   :  { %v924_v27 = vsel %vm34_vm0, %v111_v22, 2147483647  ;;  %v927_v30 = vsel %vm34_vm0, %v112_v23, 2147483647  ;;  %v180_v16 = vcvt.s32.f32 %v178_v10  ;;  %v195_v22 = vcvt.s32.f32 %v193_v48  ;;  %v550_v10 = vld [vmem:[%s1323_s3] sm:$0x1] }
  0xa8   :  { %227 = vmin.xlane.f32.xlu1 %v913_v18  ;;  %242 = vmin.xlane.f32.xlu0 %v921_v26  ;;  %v73_v31 = vpop.xlane.xlu0 %72  ;;  %v76_v20 = vpop.xlane.xlu1 %75  ;;  %v269_v21 = vshra.s32 %v924_v27, 16  ;;  %v284_v34 = vshra.s32 %v927_v30, 16  ;;  %v210_v23 = vcvt.s32.f32 %v208_v57  ;;  %v253_v4 = vand.u32 65535, %v909_v14 }
  0xa9   :  { %vm97_vm13 = vcmp.ge.f32.partialorder %v810_v24, %v73_v31  ;;  %vm98_vm14 = vcmp.ge.f32.partialorder %v815_v25, %v76_v20  ;;  %v268_v13 = vand.u32 65535, %v924_v27  ;;  %v283_v14 = vand.u32 65535, %v927_v30 }
  0xaa   :  { %v113_v35 = vsel %vm97_vm13, %v835_v33, 100  ;;  %v114_v36 = vsel %vm98_vm14, %v835_v33, 100  ;;  %v939_v37 = vcvt.s32.f32 %v269_v21  ;;  %v949_v43 = vcvt.s32.f32 %v284_v34 }
  0xab   :  { %v942_v40 = vsel %vm34_vm0, %v113_v35, 2147483647  ;;  %v945_v41 = vsel %vm34_vm0, %v114_v36, 2147483647  ;;  %v225_v21 = vcvt.s32.f32 %v223_v58  ;;  %v240_v34 = vcvt.s32.f32 %v238_v3  ;;  %v389_v58 = vld [vmem:[%s1321_s1] sm:$0xff] }
  0xac   :  { %257 = vmin.xlane.f32.xlu1 %v931_v32  ;;  %272 = vmin.xlane.f32.xlu0 %v939_v37  ;;  %v79_v42 = vpop.xlane.xlu0 %78  ;;  %v82_v24 = vpop.xlane.xlu1 %81  ;;  %v299_v25 = vshra.s32 %v942_v40, 16  ;;  %v314_v44 = vshra.s32 %v945_v41, 16  ;;  %v298_v27 = vand.u32 65535, %v942_v40  ;;  %v313_v30 = vand.u32 65535, %v945_v41 }
  0xad   :  { %vm99_vm15 = vcmp.ge.f32.partialorder %v824_v28, %v79_v42  ;;  %vm100_vm1 = vcmp.ge.f32.partialorder %v829_v29, %v82_v24  ;;  %v255_v42 = vcvt.s32.f32 %v253_v4  ;;  %v270_v24 = vcvt.s32.f32 %v268_v13 }
  0xae   :  { %v115_v45 = vsel %vm99_vm15, %v835_v33, 100  ;;  %v116_v49 = vsel %vm100_vm1, %v835_v33, 100  ;;  %v957_v50 = vcvt.s32.f32 %v299_v25  ;;  %v967_v54 = vcvt.s32.f32 %v314_v44 }
  0xaf   :  { %v960_v52 = vsel %vm34_vm0, %v115_v45, 2147483647  ;;  %v963_v53 = vsel %vm34_vm0, %v116_v49, 2147483647  ;;  %v285_v45 = vcvt.s32.f32 %v283_v14  ;;  %v300_v49 = vcvt.s32.f32 %v298_v27  ;;  %v392_v14 = vld [vmem:[%s1321_s1 + $0x18] sm:$0xff] }
  0xb0   :  { %287 = vmin.xlane.f32.xlu1 %v949_v43  ;;  %302 = vmin.xlane.f32.xlu0 %v957_v50  ;;  %v329_v28 = vshra.s32 %v960_v52, 16  ;;  %v344_v29 = vshra.s32 %v963_v53, 16  ;;  %v328_v40 = vand.u32 65535, %v960_v52  ;;  %v315_v59 = vcvt.s32.f32 %v313_v30  ;;  %v394_v30 = vld [vmem:[%s1321_s1 + $0x28] sm:$0xff] }
  0xb1   :  { %v343_v41 = vand.u32 65535, %v963_v53  ;;  %v549_v53 = vld [vmem:[%s1322_s2] sm:$0x1]  ;;  %v653_v3 = vtrunc.f32 %v389_v58 }
  0xb2   :  { %v971_v55 = vcvt.s32.f32 %v329_v28  ;;  %v975_v33 = vcvt.s32.f32 %v344_v29 }
  0xb3   :  { %v345_v63 = vcvt.s32.f32 %v343_v41 }
  0xb4   :  { %317 = vmin.xlane.f32.xlu1 %v967_v54  ;;  %332 = vmin.xlane.f32.xlu0 %v971_v55 }
  0xb8   :  { %347 = vmin.xlane.f32.xlu1 %v975_v33 }
 0x125   :  { %v979_v60 = vpop.xlane.xlu0 %122 }
 0x126   :  { %vm124_vm0 = vcmp.eq.f32.partialorder %v850_v46, %v979_v60 }
 0x127   :  { %v125_v1 = vsel %vm124_vm0, %v120_v62, inf  ;;  %v330_v62 = vcvt.s32.f32 %v328_v40 }
 0x128   :  { %126 = vmin.xlane.f32.xlu0 %v125_v1 }
 0x129   :  { %v985_v5 = vpop.xlane.xlu1 %137  ;;  %v987_v6 = vpop.xlane.xlu0 %152 }
 0x12a   :  { %vm139_vm2 = vcmp.eq.f32.partialorder %v867_v56, %v985_v5  ;;  %vm154_vm3 = vcmp.eq.f32.partialorder %v859_v51, %v987_v6  ;;  %v159_v4 = vcvt.f32.s32 %v987_v6  ;;  %v393_v6 = vld [vmem:[%s1321_s1 + $0x20] sm:$0xff] }
 0x12b   :  { %v140_v39 = vsel %vm139_vm2, %v135_v8, inf  ;;  %v155_v46 = vsel %vm154_vm3, %v150_v9, inf  ;;  %vm609_vm2 = vcmask 1040384   ;;  %vm568_vm3 = vcmask 7168  }
 0x12c   :  { %141 = vmin.xlane.f32.xlu1 %v140_v39  ;;  %156 = vmin.xlane.f32.xlu0 %v155_v46  ;;  %v551_v46 = vmax.f32 %v549_v53, 0.0 }
 0x12d   :  { %v995_v47 = vpop.xlane.xlu1 %167  ;;  %v997_v11 = vpop.xlane.xlu0 %182 }
 0x12e   :  { %vm169_vm4 = vcmp.eq.f32.partialorder %v877_v61, %v995_v47  ;;  %vm184_vm5 = vcmp.eq.f32.partialorder %v885_v2, %v997_v11  ;;  %v174_v13 = vcvt.f32.s32 %v995_v47 }
 0x12f   :  { %v170_v51 = vsel %vm169_vm4, %v165_v15, inf  ;;  %v185_v56 = vsel %vm184_vm5, %v180_v16, inf  ;;  %v552_v15 = vmul.f32 %v550_v10, %v549_v53 }
 0x130   :  { %171 = vmin.xlane.f32.xlu1 %v170_v51  ;;  %186 = vmin.xlane.f32.xlu0 %v185_v56 }
 0x131   :  { %v1005_v17 = vpop.xlane.xlu1 %197  ;;  %v1007_v19 = vpop.xlane.xlu0 %212  ;;  %v553_v51 = vsub.f32 %v551_v46, %v552_v15 }
 0x132   :  { %vm199_vm6 = vcmp.eq.f32.partialorder %v895_v7, %v1005_v17  ;;  %vm214_vm7 = vcmp.eq.f32.partialorder %v903_v12, %v1007_v19  ;;  %v219_v27 = vcvt.f32.s32 %v1007_v19  ;;  %v659_v19 = vtrunc.f32 %v392_v14 }
 0x133   :  { %v200_v61 = vsel %vm199_vm6, %v195_v22, inf  ;;  %v215_v2 = vsel %vm214_vm7, %v210_v23, inf }
 0x134   :  { %201 = vmin.xlane.f32.xlu1 %v200_v61  ;;  %216 = vmin.xlane.f32.xlu0 %v215_v2  ;;  %v129_v61 = vcvt.f32.s32 %v979_v60  ;;  %v1068_v2 = vcvt.f32.s32 %v653_v3  ;;  %v204_v60 = vcvt.f32.s32 %v1005_v17  ;;  %v1096_v17 = vshll.u32 %v174_v13, 16  ;;  %v403_v13 = vld [vmem:[%s1321_s1 + $0x70] sm:$0xff] }
 0x135   :  { %v1015_v31 = vpop.xlane.xlu1 %227  ;;  %v1017_v20 = vpop.xlane.xlu0 %242 }
 0x136   :  { %vm229_vm8 = vcmp.eq.f32.partialorder %v913_v18, %v1015_v31  ;;  %vm244_vm9 = vcmp.eq.f32.partialorder %v921_v26, %v1017_v20 }
 0x137   :  { %v230_v7 = vsel %vm229_vm8, %v225_v21, inf  ;;  %v245_v12 = vsel %vm244_vm9, %v240_v34, inf  ;;  %v144_v21 = vcvt.f32.s32 %v985_v5  ;;  %v390_v34 = vld [vmem:[%s1321_s1 + $0x8] sm:$0xff]  ;;  %v421_v5 = vcvt.s32.f32 %v1068_v2 }
 0x138   :  { %231 = vmin.xlane.f32.xlu1 %v230_v7  ;;  %246 = vmin.xlane.f32.xlu0 %v245_v12  ;;  %v391_v7 = vld [vmem:[%s1321_s1 + $0x10] sm:$0xff]  ;;  %v189_v12 = vcvt.f32.s32 %v997_v11  ;;  %v234_v11 = vcvt.f32.s32 %v1015_v31  ;;  %v1106_v31 = vshll.u32 %v204_v60, 16 }
 0x139   :  { %v1025_v35 = vpop.xlane.xlu1 %257  ;;  %v1027_v36 = vpop.xlane.xlu0 %272  ;;  %v1090_v47 = vshll.u32 %v144_v21, 16 }
 0x13a   :  { %vm259_vm10 = vcmp.eq.f32.partialorder %v931_v32, %v1025_v35  ;;  %vm274_vm11 = vcmp.eq.f32.partialorder %v939_v37, %v1027_v36  ;;  %v1103_v40 = vshll.u32 %v189_v12, 16 }
 0x13b   :  { %v260_v18 = vsel %vm259_vm10, %v255_v42, inf  ;;  %v275_v26 = vsel %vm274_vm11, %v270_v24, inf  ;;  %v1080_v42 = vshll.u32 %v129_v61, 16  ;;  %v655_v24 = vtrunc.f32 %v390_v34 }
 0x13c   :  { %261 = vmin.xlane.f32.xlu1 %v260_v18  ;;  %276 = vmin.xlane.f32.xlu0 %v275_v26  ;;  %v657_v18 = vtrunc.f32 %v391_v7  ;;  %v1094_v26 = vshll.u32 %v159_v4, 16  ;;  %v404_v7 = vld [vmem:[%s1321_s1 + $0x78] sm:$0xff] }
 0x13d   :  { %v1035_v25 = vpop.xlane.xlu1 %287  ;;  %v1037_v44 = vpop.xlane.xlu0 %302  ;;  %v1110_v41 = vcvt.f32.s32 %v655_v24 }
 0x13e   :  { %vm289_vm12 = vcmp.eq.f32.partialorder %v949_v43, %v1035_v25  ;;  %vm304_vm13 = vcmp.eq.f32.partialorder %v957_v50, %v1037_v44 }
 0x13f   :  { %v290_v32 = vsel %vm289_vm12, %v285_v45, inf  ;;  %v305_v37 = vsel %vm304_vm13, %v300_v49, inf  ;;  %v249_v45 = vcvt.f32.s32 %v1017_v20  ;;  %v264_v49 = vcvt.f32.s32 %v1025_v35  ;;  %v395_v20 = vld [vmem:[%s1321_s1 + $0x30] sm:$0xff] }
 0x140   :  { %291 = vmin.xlane.f32.xlu1 %v290_v32  ;;  %306 = vmin.xlane.f32.xlu0 %v305_v37  ;;  %v279_v32 = vcvt.f32.s32 %v1027_v36  ;;  %v661_v37 = vtrunc.f32 %v393_v6  ;;  %v1115_v35 = vshll.u32 %v219_v27, 16  ;;  %v663_v36 = vtrunc.f32 %v394_v30 }
 0x141   :  { %v1045_v28 = vpop.xlane.xlu1 %317  ;;  %v1047_v29 = vpop.xlane.xlu0 %332 }
 0x142   :  { %vm319_vm14 = vcmp.eq.f32.partialorder %v967_v54, %v1045_v28  ;;  %vm334_vm15 = vcmp.eq.f32.partialorder %v971_v55, %v1047_v29  ;;  %v554_v54 = vand.u32 2147483647, %v549_v53  ;;  %v339_v53 = vcvt.f32.s32 %v1047_v29 }
 0x143   :  { %v320_v43 = vsel %vm319_vm14, %v315_v59, inf  ;;  %v335_v50 = vsel %vm334_vm15, %v330_v62, inf  ;;  %v294_v59 = vcvt.f32.s32 %v1035_v25  ;;  %v309_v62 = vcvt.f32.s32 %v1037_v44 }
 0x144   :  { %321 = vmin.xlane.f32.xlu1 %v320_v43  ;;  %336 = vmin.xlane.f32.xlu0 %v335_v50  ;;  %v555_v1 = vsub.f32 0.0, %v554_v54  ;;  %v1117_v43 = vshll.u32 %v234_v11, 16  ;;  %v1119_v50 = vcvt.f32.s32 %v657_v18  ;;  %v1124_v25 = vshll.u32 %v249_v45, 16  ;;  %v397_v54 = vld [vmem:[%s1321_s1 + $0x40] sm:$0xff] }
 0x145   :  { %v1054_v52 = vpop.xlane.xlu1 %347  ;;  %v1126_v44 = vshll.u32 %v264_v49, 16  ;;  %v1145_v29 = vshll.u32 %v294_v59, 16  ;;  %v1147_v10 = vshll.u32 %v309_v62, 16 }
 0x146   :  { %vm349_vm1 = vcmp.eq.f32.partialorder %v975_v33, %v1054_v52  ;;  %v556_v8 = vmul.f32 1.442695, %v555_v1  ;;  %v1133_v1 = vshll.u32 %v279_v32, 16  ;;  %v354_v46 = vcvt.f32.s32 %v1054_v52 }
 0x147   :  { %v350_v0 = vsel %vm349_vm1, %v345_v63, inf  ;;  %v396_v63 = vld [vmem:[%s1321_s1 + $0x38] sm:$0xff]  ;;  %v423_v15 = vcvt.s32.f32 %v1119_v50  ;;  %v1165_v52 = vshll.u32 %v339_v53, 16 }
 0x148   :  { %351 = vmin.xlane.f32.xlu1 %v350_v0  ;;  %690 = vpow2.f32 %v556_v8  ;;  %v324_v0 = vcvt.f32.s32 %v1045_v28  ;;  %v1135_v8 = vcvt.f32.s32 %v659_v19  ;;  %v399_v28 = vld [vmem:[%s1321_s1 + $0x50] sm:$0xff]  ;;  %v1179_v6 = vshll.u32 %v354_v46, 16 }
 0x149   :  { %v673_v3 = vtrunc.f32 %v399_v28  ;;  %v681_v19 = vtrunc.f32 %v403_v13 }
 0x14a   :  { %v424_v21 = vcvt.s32.f32 %v1135_v8 }
 0x14b   :  { %v1187_v32 = vcvt.f32.s32 %v673_v3 }
 0x152   :  { %v691_v55 = vpop.eup %690 }
 0x153   :  { %v558_v9 = vadd.f32 1.0, %v691_v55  ;;  %v561_v38 = vmul.f32 -0.5, %v691_v55  ;;  %v564_v16 = vand.u32 2147483647, %v691_v55 }
 0x155   :  { %692 = vlog2.f32 %v558_v9  ;;  %v562_v39 = vadd.f32 1.0, %v561_v38  ;;  %vm565_vm0 = vcmp.lt.f32.partialorder %v564_v16, 0.0004427343  ;;  %v665_v9 = vtrunc.f32 %v395_v20  ;;  %v398_v38 = vld [vmem:[%s1321_s1 + $0x48] sm:$0xff] }
 0x156   :  { %v1152_v16 = vcvt.f32.s32 %v663_v36  ;;  %v671_v58 = vtrunc.f32 %v398_v38 }
 0x157   :  { %v563_v57 = vmul.f32 %v691_v55, %v562_v39  ;;  %v1137_v55 = vcvt.f32.s32 %v661_v37  ;;  %v422_v39 = vcvt.s32.f32 %v1110_v41  ;;  %v1169_v4 = vcvt.f32.s32 %v665_v9 }
 0x158   :  { %v426_v11 = vcvt.s32.f32 %v1152_v16  ;;  %v1185_v30 = vcvt.f32.s32 %v671_v58  ;;  %v683_v37 = vtrunc.f32 %v404_v7 }
 0x159   :  { %v425_v34 = vcvt.s32.f32 %v1137_v55  ;;  %v427_v36 = vcvt.s32.f32 %v1169_v4 }
 0x15f   :  { %v693_v33 = vpop.eup %692 }
 0x160   :  { %v560_v48 = vmul.f32 0.6931472, %v693_v33  ;;  %v667_v33 = vtrunc.f32 %v396_v63 }
 0x162   :  { %v566_v56 = vsel %vm565_vm0, %v563_v57, %v560_v48  ;;  %v669_v48 = vtrunc.f32 %v397_v54  ;;  %v400_v57 = vld [vmem:[%s1321_s1 + $0x58] sm:$0xff]  ;;  %v1177_v12 = vcvt.f32.s32 %v667_v33 }
 0x163   :  { %v567_v22 = vadd.f32 %v566_v56, %v553_v51  ;;  %v401_v51 = vld [vmem:[%s1321_s1 + $0x60] sm:$0xff]  ;;  %v402_v56 = vld [vmem:[%s1321_s1 + $0x68] sm:$0xff]  ;;  %v675_v60 = vtrunc.f32 %v400_v57  ;;  %v431_v57 = vcvt.s32.f32 %v1187_v32 }
 0x164   :  { %v677_v24 = vtrunc.f32 %v401_v51  ;;  %v679_v14 = vtrunc.f32 %v402_v56  ;;  %v1183_v18 = vcvt.f32.s32 %v669_v48  ;;  %v430_v48 = vcvt.s32.f32 %v1185_v30 }
 0x165   :  { %v610_v23 = vsel %vm609_vm2, %v567_v22, 0.0  ;;  %v1163_v22 = vshll.u32 %v324_v0, 16  ;;  %v1191_v63 = vcvt.f32.s32 %v675_v60  ;;  %v1202_v51 = vcvt.f32.s32 %v681_v19 }
 0x166   :  { %611 = vadd.xlane.f32.xlu1 %v610_v23  ;;  %v1193_v0 = vcvt.f32.s32 %v677_v24  ;;  %v1195_v53 = vcvt.f32.s32 %v679_v14  ;;  %v429_v28 = vcvt.s32.f32 %v1183_v18  ;;  %v1204_v56 = vcvt.f32.s32 %v683_v37 }
 0x167   :  { %v435_v19 = vcvt.s32.f32 %v1202_v51 }
 0x168   :  { %v433_v13 = vcvt.s32.f32 %v1193_v0  ;;  %v434_v7 = vcvt.s32.f32 %v1195_v53  ;;  %v1335_v0 = vcvt.s32.f32 %v1204_v56 }
 0x1b5   :  { %v127_v23 = vpop.xlane.xlu0 %126 }
 0x1b6   :  { %v128_v61 = vcvt.f32.s32 %v127_v23 }
 0x1b8   :  { %v131_v27 = vadd.s32 %v1080_v42, %v128_v61  ;;  %v428_v42 = vcvt.s32.f32 %v1177_v12 }
 0x1b9   :  { %v142_v45 = vpop.xlane.xlu1 %141  ;;  %v157_v49 = vpop.xlane.xlu0 %156 }
 0x1ba   :  { %v357_v59 = vadd.s32 1, %v131_v27  ;;  %v143_v62 = vcvt.f32.s32 %v142_v45  ;;  %v158_v20 = vcvt.f32.s32 %v157_v49 }
 0x1bc   :  { %v373_v54 = vcvt.s32.f32 %v357_v59  ;;  %v146_v9 = vadd.s32 %v1090_v47, %v143_v62  ;;  %v161_v38 = vadd.s32 %v1094_v26, %v158_v20  ;;  %v432_v26 = vcvt.s32.f32 %v1191_v63 }
 0x1bd   :  { %v172_v33 = vpop.xlane.xlu1 %171  ;;  %v187_v46 = vpop.xlane.xlu0 %186 }
 0x1be   :  { %v437_v23 = vsub.f32 %v373_v54, %v421_v5  ;;  %v358_v58 = vadd.s32 1, %v146_v9  ;;  %v359_v3 = vadd.s32 1, %v161_v38  ;;  %v173_v47 = vcvt.f32.s32 %v172_v33 }
 0x1bf   :  { %v188_v61 = vcvt.f32.s32 %v187_v46 }
 0x1c0   :  { %v453_v60 = vand.u32 2147483647, %v437_v23  ;;  %v485_v24 = vmul.f32 0.5, %v437_v23  ;;  %v374_v14 = vcvt.s32.f32 %v358_v58  ;;  %v375_v27 = vcvt.s32.f32 %v359_v3 }
 0x1c1   :  { %v176_v45 = vadd.s32 %v1096_v17, %v173_v47  ;;  %v191_v49 = vadd.s32 %v1103_v40, %v188_v61  ;;  %v202_v2 = vpop.xlane.xlu1 %201  ;;  %v217_v5 = vpop.xlane.xlu0 %216 }
 0x1c2   :  { %vm469_vm4 = vcmp.lt.f32.partialorder %v453_v60, 1.0  ;;  %v501_v59 = vmul.f32 %v485_v24, %v437_v23  ;;  %v637_v62 = vadd.f32 -0.5, %v453_v60  ;;  %v438_v20 = vsub.f32 %v374_v14, %v422_v39 }
 0x1c3   :  { %v439_v54 = vsub.f32 %v375_v27, %v423_v15  ;;  %v360_v9 = vadd.s32 1, %v176_v45  ;;  %v361_v38 = vadd.s32 1, %v191_v49  ;;  %v203_v17 = vcvt.f32.s32 %v202_v2 }
 0x1c4   :  { %v533_v33 = vsel %vm469_vm4, %v501_v59, %v637_v62  ;;  %v454_v40 = vand.u32 2147483647, %v438_v20  ;;  %v486_v46 = vmul.f32 0.5, %v438_v20  ;;  %v218_v58 = vcvt.f32.s32 %v217_v5 }
 0x1c5   :  { %v569_v3 = vsel %vm568_vm3, %v533_v33, 0.0  ;;  %v455_v47 = vand.u32 2147483647, %v439_v54  ;;  %v487_v61 = vmul.f32 0.5, %v439_v54  ;;  %v376_v37 = vcvt.s32.f32 %v360_v9  ;;  %v232_v23 = vpop.xlane.xlu1 %231  ;;  %v247_v14 = vpop.xlane.xlu0 %246 }
 0x1c6   :  { %vm470_vm5 = vcmp.lt.f32.partialorder %v454_v40, 1.0  ;;  %v502_v60 = vmul.f32 %v486_v46, %v438_v20  ;;  %v638_v41 = vadd.f32 -0.5, %v454_v40  ;;  %v377_v39 = vcvt.s32.f32 %v361_v38 }
 0x1c7   :  { %vm471_vm6 = vcmp.lt.f32.partialorder %v455_v47, 1.0  ;;  %v503_v50 = vmul.f32 %v487_v61, %v439_v54  ;;  %v639_v15 = vadd.f32 -0.5, %v455_v47  ;;  %v440_v24 = vsub.f32 %v376_v37, %v424_v21 }
 0x1c8   :  { %v534_v27 = vsel %vm470_vm5, %v502_v60, %v638_v41  ;;  %v441_v45 = vsub.f32 %v377_v39, %v425_v34  ;;  %v206_v49 = vadd.s32 %v1106_v31, %v203_v17  ;;  %v221_v2 = vadd.s32 %v1115_v35, %v218_v58 }
 0x1c9   :  { %v570_v5 = vsel %vm568_vm3, %v534_v27, 0.0  ;;  %v535_v59 = vsel %vm471_vm6, %v503_v50, %v639_v15  ;;  %v456_v62 = vand.u32 2147483647, %v440_v24  ;;  %v488_v20 = vmul.f32 0.5, %v440_v24  ;;  %v262_v55 = vpop.xlane.xlu1 %261  ;;  %v277_v47 = vpop.xlane.xlu0 %276 }
 0x1ca   :  { %v571_v9 = vadd.f32 %v570_v5, %v569_v3  ;;  %v572_v54 = vsel %vm568_vm3, %v535_v59, 0.0  ;;  %v457_v38 = vand.u32 2147483647, %v441_v45  ;;  %v489_v8 = vmul.f32 0.5, %v441_v45 }
 0x1cb   :  { %vm472_vm7 = vcmp.lt.f32.partialorder %v456_v62, 1.0  ;;  %v504_v21 = vmul.f32 %v488_v20, %v440_v24  ;;  %v640_v37 = vadd.f32 -0.5, %v456_v62  ;;  %v362_v33 = vadd.s32 1, %v206_v49 }
 0x1cc   :  { %v573_v34 = vadd.f32 %v572_v54, %v571_v9  ;;  %vm473_vm8 = vcmp.lt.f32.partialorder %v457_v38, 1.0  ;;  %v505_v31 = vmul.f32 %v489_v8, %v441_v45  ;;  %v641_v17 = vadd.f32 -0.5, %v457_v38 }
 0x1cd   :  { %v536_v35 = vsel %vm472_vm7, %v504_v21, %v640_v37  ;;  %v378_v40 = vcvt.s32.f32 %v362_v33  ;;  %v363_v46 = vadd.s32 1, %v221_v2  ;;  %v233_v58 = vcvt.f32.s32 %v232_v23  ;;  %v292_v62 = vpop.xlane.xlu1 %291 }
 0x1ce   :  { %v574_v3 = vsel %vm568_vm3, %v536_v35, 0.0  ;;  %v537_v61 = vsel %vm473_vm8, %v505_v31, %v641_v17  ;;  %v248_v60 = vcvt.f32.s32 %v247_v14  ;;  %v263_v41 = vcvt.f32.s32 %v262_v55 }
 0x1cf   :  { %v575_v39 = vadd.f32 %v574_v3, %v573_v34  ;;  %v576_v50 = vsel %vm568_vm3, %v537_v61, 0.0  ;;  %v442_v15 = vsub.f32 %v378_v40, %v426_v11  ;;  %v379_v24 = vcvt.s32.f32 %v363_v46 }
 0x1d0   :  { %v236_v27 = vadd.s32 %v1117_v43, %v233_v58  ;;  %v251_v45 = vadd.s32 %v1124_v25, %v248_v60  ;;  %v266_v49 = vadd.s32 %v1126_v44, %v263_v41  ;;  %v278_v23 = vcvt.f32.s32 %v277_v47  ;;  %v307_v58 = vpop.xlane.xlu0 %306 }
 0x1d1   :  { %v577_v2 = vadd.f32 %v576_v50, %v575_v39  ;;  %v458_v5 = vand.u32 2147483647, %v442_v15  ;;  %v490_v59 = vmul.f32 0.5, %v442_v15  ;;  %v443_v14 = vsub.f32 %v379_v24, %v427_v36  ;;  %v322_v47 = vpop.xlane.xlu1 %321 }
 0x1d2   :  { %v364_v20 = vadd.s32 1, %v236_v27  ;;  %v365_v9 = vadd.s32 1, %v251_v45  ;;  %v366_v54 = vadd.s32 1, %v266_v49  ;;  %v281_v16 = vadd.s32 %v1133_v1, %v278_v23 }
 0x1d3   :  { %vm474_vm9 = vcmp.lt.f32.partialorder %v458_v5, 1.0  ;;  %v506_v11 = vmul.f32 %v490_v59, %v442_v15  ;;  %v642_v43 = vadd.f32 -0.5, %v458_v5  ;;  %v459_v38 = vand.u32 2147483647, %v443_v14 }
 0x1d4   :  { %v491_v25 = vmul.f32 0.5, %v443_v14  ;;  %v380_v8 = vcvt.s32.f32 %v364_v20  ;;  %v381_v44 = vcvt.s32.f32 %v365_v9  ;;  %v382_v21 = vcvt.s32.f32 %v366_v54  ;;  %v337_v20 = vpop.xlane.xlu0 %336 }
 0x1d5   :  { %v538_v37 = vsel %vm474_vm9, %v506_v11, %v642_v43  ;;  %vm1238_vm10 = vcmp.lt.f32.partialorder %v459_v38, 1.0  ;;  %v643_v4 = vadd.f32 -0.5, %v459_v38  ;;  %v367_v36 = vadd.s32 1, %v281_v16  ;;  %v352_v9 = vpop.xlane.xlu1 %351 }
 0x1d6   :  { %v578_v55 = vsel %vm568_vm3, %v538_v37, 0.0  ;;  %v507_v34 = vmul.f32 %v491_v25, %v443_v14  ;;  %v444_v1 = vsub.f32 %v380_v8, %v428_v42  ;;  %v445_v31 = vsub.f32 %v381_v44, %v429_v28 }
 0x1d7   :  { %v579_v17 = vadd.f32 %v578_v55, %v577_v2  ;;  %v446_v35 = vsub.f32 %v382_v21, %v430_v48  ;;  %v383_v40 = vcvt.s32.f32 %v367_v36  ;;  %v293_v46 = vcvt.f32.s32 %v292_v62 }
 0x1d8   :  { %v539_v3 = vsel %vm1238_vm10, %v507_v34, %v643_v4  ;;  %v460_v61 = vand.u32 2147483647, %v444_v1  ;;  %v492_v60 = vmul.f32 0.5, %v444_v1  ;;  %v461_v41 = vand.u32 2147483647, %v445_v31 }
 0x1d9   :  { %v580_v12 = vsel %vm568_vm3, %v539_v3, 0.0  ;;  %v493_v42 = vmul.f32 0.5, %v445_v31  ;;  %v462_v39 = vand.u32 2147483647, %v446_v35  ;;  %v494_v18 = vmul.f32 0.5, %v446_v35 }
 0x1da   :  { %v581_v28 = vadd.f32 %v580_v12, %v579_v17  ;;  %vm476_vm11 = vcmp.lt.f32.partialorder %v460_v61, 1.0  ;;  %v508_v50 = vmul.f32 %v492_v60, %v444_v1  ;;  %v644_v30 = vadd.f32 -0.5, %v460_v61 }
 0x1db   :  { %vm1252_vm12 = vcmp.lt.f32.partialorder %v461_v41, 1.0  ;;  %v509_v15 = vmul.f32 %v493_v42, %v445_v31  ;;  %v645_v24 = vadd.f32 -0.5, %v461_v41  ;;  %vm1256_vm13 = vcmp.lt.f32.partialorder %v462_v39, 1.0 }
 0x1dc   :  { %v540_v45 = vsel %vm476_vm11, %v508_v50, %v644_v30  ;;  %v510_v49 = vmul.f32 %v494_v18, %v446_v35  ;;  %v646_v23 = vadd.f32 -0.5, %v462_v39  ;;  %v447_v2 = vsub.f32 %v383_v40, %v431_v57 }
 0x1dd   :  { %v582_v5 = vsel %vm568_vm3, %v540_v45, 0.0  ;;  %v541_v59 = vsel %vm1252_vm12, %v509_v15, %v645_v24  ;;  %v296_v14 = vadd.s32 %v1145_v29, %v293_v46  ;;  %v308_v62 = vcvt.f32.s32 %v307_v58 }
 0x1de   :  { %v583_v54 = vadd.f32 %v582_v5, %v581_v28  ;;  %v584_v16 = vsel %vm568_vm3, %v541_v59, 0.0  ;;  %v542_v11 = vsel %vm1256_vm13, %v510_v49, %v646_v23  ;;  %v463_v43 = vand.u32 2147483647, %v447_v2 }
 0x1df   :  { %v495_v38 = vmul.f32 0.5, %v447_v2  ;;  %v368_v32 = vadd.s32 1, %v296_v14  ;;  %v311_v57 = vadd.s32 %v1147_v10, %v308_v62  ;;  %v323_v25 = vcvt.f32.s32 %v322_v47 }
 0x1e0   :  { %vm1270_vm14 = vcmp.lt.f32.partialorder %v463_v43, 1.0  ;;  %v647_v29 = vadd.f32 -0.5, %v463_v43  ;;  %v338_v44 = vcvt.f32.s32 %v337_v20  ;;  %v353_v21 = vcvt.f32.s32 %v352_v9 }
 0x1e1   :  { %v511_v37 = vmul.f32 %v495_v38, %v447_v2  ;;  %v384_v33 = vcvt.s32.f32 %v368_v32  ;;  %v369_v4 = vadd.s32 1, %v311_v57  ;;  %v326_v36 = vadd.s32 %v1163_v22, %v323_v25 }
 0x1e2   :  { %v341_v55 = vadd.s32 %v1165_v52, %v338_v44  ;;  %v356_v34 = vadd.s32 %v1179_v6, %v353_v21  ;;  %v585_v1 = vadd.f32 %v584_v16, %v583_v54  ;;  %v586_v10 = vsel %vm568_vm3, %v542_v11, 0.0 }
 0x1e3   :  { %v448_v31 = vsub.f32 %v384_v33, %v432_v26  ;;  %v385_v17 = vcvt.s32.f32 %v369_v4  ;;  %v370_v35 = vadd.s32 1, %v326_v36  ;;  %v543_v40 = vsel %vm1270_vm14, %v511_v37, %v647_v29 }
 0x1e4   :  { %v371_v46 = vadd.s32 1, %v341_v55  ;;  %v372_v58 = vadd.s32 1, %v356_v34  ;;  %v587_v47 = vadd.f32 %v586_v10, %v585_v1  ;;  %v588_v22 = vsel %vm568_vm3, %v543_v40, 0.0 }
 0x1e5   :  { %v464_v3 = vand.u32 2147483647, %v448_v31  ;;  %v496_v52 = vmul.f32 0.5, %v448_v31  ;;  %v449_v6 = vsub.f32 %v385_v17, %v433_v13  ;;  %v386_v61 = vcvt.s32.f32 %v370_v35 }
 0x1e6   :  { %v387_v60 = vcvt.s32.f32 %v371_v46  ;;  %v388_v41 = vcvt.s32.f32 %v372_v58  ;;  %v589_v63 = vadd.f32 %v588_v22, %v587_v47 }
 0x1e7   :  { %vm1285_vm15 = vcmp.lt.f32.partialorder %v464_v3, 1.0  ;;  %v512_v12 = vmul.f32 %v496_v52, %v448_v31  ;;  %v648_v42 = vadd.f32 -0.5, %v464_v3  ;;  %v465_v39 = vand.u32 2147483647, %v449_v6 }
 0x1e8   :  { %v497_v18 = vmul.f32 0.5, %v449_v6  ;;  %v450_v28 = vsub.f32 %v386_v61, %v434_v7  ;;  %v451_v50 = vsub.f32 %v387_v60, %v435_v19  ;;  %v452_v13 = vsub.f32 %v388_v41, %v1335_v0 }
 0x1e9   :  { %v649_v30 = vadd.f32 -0.5, %v465_v39  ;;  %vm1295_vm1 = vcmp.lt.f32.partialorder %v465_v39, 1.0  ;;  %v544_v15 = vsel %vm1285_vm15, %v512_v12, %v648_v42 }
 0x1ea   :  { %v513_v24 = vmul.f32 %v497_v18, %v449_v6  ;;  %v466_v27 = vand.u32 2147483647, %v450_v28  ;;  %v498_v45 = vmul.f32 0.5, %v450_v28  ;;  %v499_v49 = vmul.f32 0.5, %v451_v50 }
 0x1eb   :  { %v467_v53 = vand.u32 2147483647, %v451_v50  ;;  %v468_v7 = vand.u32 2147483647, %v452_v13  ;;  %v500_v23 = vmul.f32 0.5, %v452_v13  ;;  %v590_v51 = vsel %vm568_vm3, %v544_v15, 0.0 }
 0x1ec   :  { %v514_v19 = vmul.f32 %v498_v45, %v450_v28  ;;  %vm482_vm0 = vcmp.lt.f32.partialorder %v466_v27, 1.0  ;;  %v515_v56 = vmul.f32 %v499_v49, %v451_v50  ;;  %v650_v2 = vadd.f32 -0.5, %v466_v27 }
 0x1ed   :  { %vm483_vm2 = vcmp.lt.f32.partialorder %v467_v53, 1.0  ;;  %vm484_vm4 = vcmp.lt.f32.partialorder %v468_v7, 1.0  ;;  %v516_v5 = vmul.f32 %v500_v23, %v452_v13  ;;  %v651_v59 = vadd.f32 -0.5, %v467_v53 }
 0x1ee   :  { %v652_v14 = vadd.f32 -0.5, %v468_v7  ;;  %v545_v62 = vsel %vm1295_vm1, %v513_v24, %v649_v30  ;;  %v546_v20 = vsel %vm482_vm0, %v514_v19, %v650_v2  ;;  %v591_v9 = vadd.f32 %v590_v51, %v589_v63 }
 0x1ef   :  { %v592_v54 = vsel %vm568_vm3, %v545_v62, 0.0  ;;  %v594_v16 = vsel %vm568_vm3, %v546_v20, 0.0  ;;  %v547_v11 = vsel %vm483_vm2, %v515_v56, %v651_v59 }
 0x1f0   :  { %v548_v43 = vsel %vm484_vm4, %v516_v5, %v652_v14  ;;  %v593_v38 = vadd.f32 %v592_v54, %v591_v9  ;;  %v596_v57 = vsel %vm568_vm3, %v547_v11, 0.0 }
 0x1f1   :  { %v598_v25 = vsel %vm568_vm3, %v548_v43, 0.0 }
 0x1f2   :  { %v595_v32 = vadd.f32 %v594_v16, %v593_v38 }
 0x1f3   :  { %v612_v44 = vpop.xlane.xlu1 %611 }
 0x1f4   :  { %v597_v8 = vadd.f32 %v596_v57, %v595_v32  ;;  %v613_v21 = vrot.slane %v612_v44, 4 }
 0x1f6   :  { %v599_v29 = vadd.f32 %v598_v25, %v597_v8  ;;  %v614_v37 = vadd.f32 %v613_v21, %v612_v44 }
 0x1f8   :  { %600 = vadd.xlane.f32.xlu0 %v599_v29  ;;  %v615_v33 = vrot.slane %v614_v37, 2 }
 0x1fa   :  { %v616_v34 = vadd.f32 %v615_v33, %v614_v37 }
 0x1fc   :  { %v617_v31 = vrot.slane %v616_v34, 1 }
 0x1fe   :  { %v618_v40 = vadd.f32 %v617_v31, %v616_v34 }
 0x285   :  { %v601_v4 = vpop.xlane.xlu0 %600 }
 0x286   :  { %v602_v36 = vrot.slane %v601_v4, 4 }
 0x288   :  { %v603_v55 = vadd.f32 %v602_v36, %v601_v4 }
 0x28a   :  { %v604_v1 = vrot.slane %v603_v55, 2 }
 0x28c   :  { %v605_v10 = vadd.f32 %v604_v1, %v603_v55 }
 0x28e   :  { %v606_v17 = vrot.slane %v605_v10, 1 }
 0x290   :  { %v607_v35 = vadd.f32 %v606_v17, %v605_v10 }
 0x292   :  { %685 = vpush %v607_v35 }
 0x293   :  { %687 = vpush %v618_v40 }
 0x2c3   :  { %s686_s1 = spop %685 }
 0x2c4   :  { %s688_s25 = spop %687 }
 0x2c5   :  { %s620_s26 = sadd.f32 %s688_s25, %s686_s1 }
 0x2c7   :  { %s621_s27 = smul.f32 0.0078125, %s620_s26 }
 0x2c9   :  { %623 = sst [smem:[#allocation2]] %s621_s27 }
 0x2ca   :  { %703 = shalt.err (!%p700_p2)
}
 0x2cb   :  { %s706_s9 = smov [#allocation2]  }
 0x2cc   :  { %631 = dma.smem_to_hbm %s706_s9, 16, %s1324_s4, [#allocation3]  }
 0x2cd   :  { %704 = dma.done.wait [#allocation3], 16  }
 0x2ce   :  { %705 = vsyncadd [#allocation3], 4294967280 }
 0x2cf   :  { %635 = sfence }
 0x2d0   :  { %636 = vsyncpa [#allocation3], 1 }

</bundles_post_ra>
